<compile_context>
chip_gen: v7x
topology: tpu7x:2x2x1
jax: 0.10.0
libtpu: 0.0.40
codegen_flags: <defaults>
</compile_context>

<pallas_src>
import numpy as np
import jax
import jax.numpy as jnp
from jax.experimental import pallas as pl
from jax.experimental.pallas import tpu as pltpu

_TARGET_BLOCK_B = 128   # rows per grid step (cap)
_TARGET_BLOCK_T = 512   # lanes per grid step; T_pad is rounded up to this
_LEN_LANES = 128        # lane-dense width of the lengths side input


def _round_up(x, m):
    return ((x + m - 1) // m) * m


def _pad_mask_kernel(lens_ref, packed_ref, out_ref):
    """lens_ref: (blk_b, 128) int32 VMEM, per-row length in column 0.
    packed_ref: (blk_b, blk_t) int16/int32/f32, garbage past each row's length.
    out_ref: (blk_b, blk_t) float32."""
    blk_b, blk_t = out_ref.shape
    col = (jax.lax.broadcasted_iota(jnp.int32, (blk_b, blk_t), 1)
           + pl.program_id(1) * blk_t)
    lens_col = lens_ref[:, :1]                  # (blk_b, 1) broadcast column
    mask = col < lens_col                       # one compare per output vreg
    vals = packed_ref[...].astype(jnp.float32)  # single cast stream
    out_ref[...] = jnp.where(mask, vals, 0.0)   # lane-dense full store


def pallas_pad_sequence(packed_padded, lens2d, block_b, block_t):
    """packed_padded: (B_pad, T_pad) int16/int32/f32, garbage past lengths.
    lens2d: (B_pad, 128) int32, lengths in column 0.
    Returns (B_pad, T_pad) float32 with positions >= length zeroed."""
    B_pad, T_pad = packed_padded.shape
    grid = (B_pad // block_b, T_pad // block_t)
    return pl.pallas_call(
        _pad_mask_kernel,
        out_shape=jax.ShapeDtypeStruct((B_pad, T_pad), jnp.float32),
        grid=grid,
        in_specs=[
            # lengths: block index (i, 0) constant along j -> fetched once per i
            pl.BlockSpec((block_b, _LEN_LANES), lambda i, j: (i, 0)),
            pl.BlockSpec((block_b, block_t), lambda i, j: (i, j)),
        ],
        out_specs=pl.BlockSpec((block_b, block_t), lambda i, j: (i, j)),
        compiler_params=pltpu.CompilerParams(
            dimension_semantics=("parallel", "parallel")
        ),
    )(lens2d, packed_padded)


class Aligner:
    """JAX/Pallas port of the torch Aligner module.

    torch forward: load <root>/<idx>.npy per index, return
    pad_sequence(durations, batch_first=True).float().
    """

    def __init__(self, root="synthetic_root"):
        self.root = root

    # TODO(synk): np.load(os.path.join(root, f"{idx}.npy")) is file I/O with no
    # Pallas equivalent; durations are generated deterministically in-script.
    def _load_duration(self, idx):
        key = jax.random.fold_in(jax.random.PRNGKey(0), int(idx))
        length = int(3 + (int(idx) * 2 + 1) % 6)  # varied lengths in [3, 8]
        return np.asarray(
            jax.random.randint(key, (length,), 1, 20, dtype=jnp.int32)
        )

    def forward(self, index):
        durations = [self._load_duration(i) for i in index]
        lengths = np.array([d.shape[0] for d in durations], dtype=np.int32)
        B = len(durations)
        T = int(lengths.max())

        # --- Tile sizing (lane-dense, recompile-free buckets) ---------------
        # T_pad is a multiple of the fixed 512-lane tile, so block_t never
        # degenerates.  block_b is a multiple of 16 (int16 sublane tile),
        # capped at 128, and split into >=2 row blocks when the batch allows
        # (keeps v7x's two TensorCores busy).  Per-step double-buffered VMEM
        # footprint at 128x512 is ~1 MiB -> safe on v7x's 64 MiB VMEM.
        block_t = _TARGET_BLOCK_T
        T_pad = _round_up(max(T, 1), block_t)
        B16 = _round_up(B, 16)
        if B16 <= 16:
            block_b = 16
        elif B16 <= 2 * _TARGET_BLOCK_B:
            block_b = _round_up((B16 + 1) // 2, 16)
        else:
            block_b = _TARGET_BLOCK_B
        B_pad = _round_up(B16, block_b)

        # --- Host glue: pick a narrow pack dtype, pack ragged rows ----------
        all_int = all(np.issubdtype(d.dtype, np.integer) for d in durations)
        if all_int:
            vmax = max((int(d.max()) for d in durations if d.size), default=0)
            vmin = min((int(d.min()) for d in durations if d.size), default=0)
            if np.iinfo(np.int16).min < vmin and vmax < np.iinfo(np.int16).max:
                pack_dtype = np.int16   # halves input HBM traffic
            else:
                pack_dtype = np.int32
        else:
            pack_dtype = np.float32

        # Garbage past each row's end and in padded rows -- the kernel's mask
        # (lengths column) does the zeroing, matching pad_sequence semantics.
        packed = np.full((B_pad, T_pad), -12345, dtype=pack_dtype)
        for b, d in enumerate(durations):
            packed[b, : d.shape[0]] = d.astype(pack_dtype)
        lens2d = np.zeros((B_pad, _LEN_LANES), dtype=np.int32)
        lens2d[:B, 0] = lengths

        out_full = pallas_pad_sequence(
            jnp.asarray(packed), jnp.asarray(lens2d), block_b, block_t
        )
        return out_full[:B, :T]  # drop bucket padding -> exact module output


if __name__ == "__main__":
    index = [0, 1, 2, 3]
    aligner = Aligner()

    out = aligner.forward(index)
    out = jax.block_until_ready(out)

    # Pure-numpy reference of pad_sequence(...).float()
    durs = [np.asarray(aligner._load_duration(i), dtype=np.float32) for i in index]
    T = max(d.shape[0] for d in durs)
    ref = np.zeros((len(durs), T), dtype=np.float32)
    for b, d in enumerate(durs):
        ref[b, : d.shape[0]] = d

    assert out.shape == ref.shape, (out.shape, ref.shape)
    assert out.dtype == jnp.float32
    np.testing.assert_allclose(np.asarray(out), ref, rtol=0, atol=0)
    print("KERNEL_OK")
</pallas_src>

<mosaic_0001>
module attributes {stable_mosaic.version = 11 : i64} {
  func.func @_pad_mask_kernel(%arg0: i32, %arg1: i32, %arg2: memref<16x128xi32, #tpu.memory_space<vmem>>, %arg3: memref<16x512xi16, #tpu.memory_space<vmem>>, %arg4: memref<16x512xf32, #tpu.memory_space<vmem>>) attributes {dimension_semantics = [#tpu.dimension_semantics<parallel>, #tpu.dimension_semantics<parallel>], iteration_bounds = array<i64: 1, 1>, scalar_prefetch = 0 : i64, scratch_operands = 0 : i64, tpu.core_type = #tpu.core_type<tc>, window_params = [{transform_indices = @transform_0, window_bounds = array<i64: 16, 128>}, {transform_indices = @transform_1, window_bounds = array<i64: 16, 512>}, {transform_indices = @transform_2, window_bounds = array<i64: 16, 512>}]} {
    %0 = tpu.iota {dimensions = array<i32: 1>} : vector<16x512xi32>
    %c512_i32 = arith.constant 512 : i32
    %1 = arith.muli %arg1, %c512_i32 : i32
    %2 = vector.broadcast %1 : i32 to vector<16x512xi32>
    %3 = arith.addi %0, %2 : vector<16x512xi32>
    %c0 = arith.constant 0 : index
    %c0_0 = arith.constant 0 : index
    %4 = vector.load %arg2[%c0, %c0_0] : memref<16x128xi32, #tpu.memory_space<vmem>>, vector<16x1xi32>
    %5 = vector.broadcast %4 : vector<16x1xi32> to vector<16x512xi32>
    %6 = arith.cmpi slt, %3, %5 : vector<16x512xi32>
    %c0_1 = arith.constant 0 : index
    %c0_2 = arith.constant 0 : index
    %7 = vector.load %arg3[%c0_1, %c0_2] : memref<16x512xi16, #tpu.memory_space<vmem>>, vector<16x512xi16>
    %8 = arith.sitofp %7 : vector<16x512xi16> to vector<16x512xf32>
    %cst = arith.constant 0.000000e+00 : f32
    %9 = vector.broadcast %cst : f32 to vector<16x512xf32>
    %10 = arith.select %6, %8, %9 : vector<16x512xi1>, vector<16x512xf32>
    %c0_3 = arith.constant 0 : index
    %c0_4 = arith.constant 0 : index
    %11 = vector.load %arg4[%c0_3, %c0_4] : memref<16x512xf32, #tpu.memory_space<vmem>>, vector<16x512xf32>
    tpu.vector_store %arg4[%c0_3, %c0_4], %10 {strides = array<i32>} : memref<16x512xf32, #tpu.memory_space<vmem>>, vector<16x512xf32>,
    return
  }
  func.func @transform_0(%arg0: i32, %arg1: i32) -> (i32, i32) {
    %c0_i32 = arith.constant 0 : i32
    %c0_i32_0 = arith.constant 0 : i32
    return %arg0, %c0_i32 : i32, i32
  }
  func.func @transform_1(%arg0: i32, %arg1: i32) -> (i32, i32) {
    %c0_i32 = arith.constant 0 : i32
    return %arg0, %arg1 : i32, i32
  }
  func.func @transform_2(%arg0: i32, %arg1: i32) -> (i32, i32) {
    %c0_i32 = arith.constant 0 : i32
    return %arg0, %arg1 : i32, i32
  }
}

</mosaic_0001>

<bundles_post_ra>
// kernel: tpu_custom_call.1
= control target key start
LH: loop header
LB: loop body
LE: loop exit
PB: predicated region body
PF: predicated region fallthrough
CT: control target
= control target key end

     0   :  { %7 = vsyncpa [#allocation3], 0  ;;  %s272_s0 = inlined_call_operand.hbm [shape: s32[16,128], index: 0, kind: input, shape index: {}]   ;;  %s273_s1 = inlined_call_operand.hbm [shape: s16[16,512], index: 1, kind: input, shape index: {}]   ;;  %s274_s2 = inlined_call_operand.hbm [shape: f32[16,512], index: 2, kind: output, shape index: {}]  }
   0x1   :  { %8 = vsyncpa [#allocation6], 0 }
   0x2   :  { %9 = vsyncpa [#allocation4], 0  ;;  %s204_s9 = smov [#allocation2]   ;;  %s132_s13 = scalar_lea.hbm %s272_s0, 256 }
   0x3   :  { %s15_s10 = sshll.u32 %s204_s9, 4  ;;  %p133_p0 = scmp.ne.s32.totalorder %s272_s0, %s132_s13  ;;  %s16_s10 = int_to_ptr.vmem [resolvable:$true] %s15_s10 }
   0x4   :  { %p136_p1 = scmp.lt.u32.totalorder %s132_s13, %s272_s0 }
   0x6   :  { %p138_p2 = pnand %p136_p1, %p133_p0 }
   0x8   :  { %141 = shalt.err (!%p138_p2)
}
   0x9   :  { %s142_s18 = scalar_lea.vmem %s16_s10, 256  ;;  %p147_p4 = scmp.lt.s32.totalorder %s16_s10, %s16_s10 }
   0xa   :  { %p143_p3 = scmp.ne.s32.totalorder %s16_s10, %s142_s18  ;;  %p148_p5 = scmp.lt.s32.totalorder %s142_s18, %s142_s18 }
   0xc   :  { %p149_p6 = por %p148_p5, %p147_p4 }
   0xe   :  { %p150_p7 = pnand %p149_p6, %p143_p3 }
  0x10   :  { %153 = shalt.err (!%p150_p7)
}
  0x11   :  { %s205_s19 = smov 128   ;;  %s206_s20 = smov 8  }
  0x12   :  { %21 = dma.hbm_to_vmem [thread:$0]  %s272_s0, 256, %s16_s10, [#allocation3], %s205_s19, %s205_s19, %s206_s20  }
  0x13   :  { %s207_s23 = smov [#allocation5]   ;;  %s154_s27 = scalar_lea.hbm %s273_s1, 512 }
  0x14   :  { %s27_s24 = sshll.u32 %s207_s23, 4  ;;  %p155_p8 = scmp.ne.s32.totalorder %s273_s1, %s154_s27  ;;  %s28_s24 = int_to_ptr.vmem [resolvable:$true] %s27_s24 }
  0x15   :  { %p158_p9 = scmp.lt.u32.totalorder %s154_s27, %s273_s1 }
  0x17   :  { %p160_p10 = pnand %p158_p9, %p155_p8 }
  0x19   :  { %163 = shalt.err (!%p160_p10)
}
  0x1a   :  { %s164_s4 = scalar_lea.vmem %s28_s24, 512  ;;  %p169_p12 = scmp.lt.s32.totalorder %s28_s24, %s28_s24 }
  0x1b   :  { %p165_p11 = scmp.ne.s32.totalorder %s28_s24, %s164_s4  ;;  %p170_p13 = scmp.lt.s32.totalorder %s164_s4, %s164_s4 }
  0x1d   :  { %p171_p0 = por %p170_p13, %p169_p12 }
  0x1f   :  { %p172_p1 = pnand %p171_p0, %p165_p11 }
  0x21   :  { %175 = shalt.err (!%p172_p1)
}
  0x22   :  { %s208_s0 = smov 256   ;;  %s209_s5 = smov 16  }
  0x23   :  { %33 = dma.hbm_to_vmem [thread:$0]  %s273_s1, 512, %s28_s24, [#allocation6], %s208_s0, %s208_s0, %s209_s5  }
  0x24   :  { %198 = dma.done.wait [#allocation3], 256  }
  0x25   :  { %199 = vsyncadd [#allocation3], 4294967040 }
  0x26   :  { %200 = dma.done.wait [#allocation6], 512  }
  0x27   :  { %201 = vsyncadd [#allocation6], 4294966784  ;;  %v210_v0 = vmov 0   ;;  %v51_v1 = vld [vmem:[#allocation2] sm:$0xff]  ;;  %v52_v2 = vld [vmem:[#allocation2 + $0x8] sm:$0xff]  ;;  %v40_v3 = vlaneseq  ;;  %s211_s1 = smov [#allocation7]  }
  0x28   :  { %131 = vset.pattern.permute.xlu0 %v210_v0  ;;  %v67_v4 = vld [vmem:[#allocation5] sm:$0xff]  ;;  %v68_v5 = vld [vmem:[#allocation5 + $0x8] sm:$0xff]  ;;  %v69_v7 = vld [vmem:[#allocation5 + $0x10] sm:$0xff]  ;;  %s108_s8 = sshll.u32 %s211_s1, 4  ;;  %s253_s8 = int_to_ptr.vmem [resolvable:$true] %s108_s8 }
  0x29   :  { %54 = vperm.xlu0 %131, %v51_v1   ;;  %v41_v6 = vand.u32 127, %v40_v3  ;;  %v70_v8 = vld [vmem:[#allocation5 + $0x18] sm:$0xff]  ;;  %v71_v9 = vunpack.c.l.b16 %v67_v4  ;;  %v72_v10 = vunpack.c.h.b16 %v67_v4  ;;  %v73_v11 = vunpack.c.l.b16 %v68_v5  ;;  %s176_s9 = scalar_lea.vmem %s253_s8, 1024  ;;  %p181_p3 = scmp.lt.s32.totalorder %s253_s8, %s253_s8 }
  0x2a   :  { %v74_v12 = vunpack.c.h.b16 %v68_v5  ;;  %v75_v13 = vunpack.c.l.b16 %v69_v7  ;;  %v76_v14 = vunpack.c.h.b16 %v69_v7  ;;  %v77_v15 = vunpack.c.l.b16 %v70_v8  ;;  %p177_p2 = scmp.ne.s32.totalorder %s253_s8, %s176_s9  ;;  %p182_p4 = scmp.lt.s32.totalorder %s176_s9, %s176_s9 }
  0x2b   :  { %v78_v16 = vunpack.c.h.b16 %v70_v8  ;;  %v42_v17 = vadd.s32 128, %v41_v6  ;;  %v43_v18 = vadd.s32 256, %v41_v6  ;;  %v44_v19 = vadd.s32 384, %v41_v6 }
  0x2c   :  { %v79_v20 = vcvt.s32.f32 %v71_v9  ;;  %v80_v21 = vcvt.s32.f32 %v72_v10  ;;  %v81_v22 = vcvt.s32.f32 %v73_v11  ;;  %v82_v23 = vcvt.s32.f32 %v74_v12  ;;  %p183_p5 = por %p182_p4, %p181_p3 }
  0x2d   :  { %57 = vperm.xlu0 %131, %v52_v2   ;;  %v83_v25 = vcvt.s32.f32 %v75_v13  ;;  %v84_v26 = vcvt.s32.f32 %v76_v14  ;;  %v85_v27 = vcvt.s32.f32 %v77_v15  ;;  %v86_v28 = vcvt.s32.f32 %v78_v16 }
  0x2e   :  { %p184_p6 = pnand %p183_p5, %p177_p2 }
  0xa8   :  { %v55_v24 = vpop.permute.xlu0 %54 }
  0xa9   :  { %vm59_vm0 = vcmp.lt.s32.totalorder %v41_v6, %v55_v24  ;;  %vm60_vm1 = vcmp.lt.s32.totalorder %v42_v17, %v55_v24  ;;  %vm61_vm2 = vcmp.lt.s32.totalorder %v43_v18, %v55_v24  ;;  %vm62_vm3 = vcmp.lt.s32.totalorder %v44_v19, %v55_v24 }
  0xaa   :  { %v87_v29 = vsel %vm59_vm0, %v79_v20, 0.0  ;;  %v88_v30 = vsel %vm60_vm1, %v80_v21, 0.0  ;;  %v89_v31 = vsel %vm61_vm2, %v81_v22, 0.0  ;;  %v90_v32 = vsel %vm62_vm3, %v82_v23, 0.0 }
  0xab   :  { %95 = vst [vmem:[#allocation7] sm:$0xff] %v87_v29  ;;  %96 = vst [vmem:[#allocation7 + $0x8] sm:$0xff] %v88_v30 }
  0xac   :  { %97 = vst [vmem:[#allocation7 + $0x10] sm:$0xff] %v89_v31  ;;  %98 = vst [vmem:[#allocation7 + $0x18] sm:$0xff] %v90_v32  ;;  %v58_v33 = vpop.permute.xlu0 %57 }
  0xad   :  { %vm63_vm4 = vcmp.lt.s32.totalorder %v41_v6, %v58_v33  ;;  %vm64_vm5 = vcmp.lt.s32.totalorder %v42_v17, %v58_v33  ;;  %vm65_vm6 = vcmp.lt.s32.totalorder %v43_v18, %v58_v33  ;;  %vm66_vm7 = vcmp.lt.s32.totalorder %v44_v19, %v58_v33 }
  0xae   :  { %v91_v34 = vsel %vm63_vm4, %v83_v25, 0.0  ;;  %v92_v35 = vsel %vm64_vm5, %v84_v26, 0.0  ;;  %v93_v36 = vsel %vm65_vm6, %v85_v27, 0.0  ;;  %v94_v37 = vsel %vm66_vm7, %v86_v28, 0.0 }
  0xaf   :  { %99 = vst [vmem:[#allocation7 + $0x20] sm:$0xff] %v91_v34  ;;  %100 = vst [vmem:[#allocation7 + $0x28] sm:$0xff] %v92_v35 }
  0xb0   :  { %101 = vst [vmem:[#allocation7 + $0x30] sm:$0xff] %v93_v36  ;;  %102 = vst [vmem:[#allocation7 + $0x38] sm:$0xff] %v94_v37 }
  0xb1   :  { %187 = shalt.err (!%p184_p6)
}
  0xb2   :  { %s188_s12 = scalar_lea.hbm %s274_s2, 1024 }
  0xb3   :  { %p189_p7 = scmp.ne.s32.totalorder %s274_s2, %s188_s12  ;;  %p192_p8 = scmp.lt.u32.totalorder %s188_s12, %s274_s2 }
  0xb5   :  { %p194_p9 = pnand %p192_p8, %p189_p7 }
  0xb7   :  { %197 = shalt.err (!%p194_p9)
}
  0xb8   :  { %s212_s17 = smov 512   ;;  %s213_s18 = smov 32  }
  0xb9   :  { %114 = dma.vmem_to_hbm [thread:$0]  %s253_s8, 1024, %s274_s2, [#allocation4], %s212_s17, %s212_s17, %s213_s18  }
  0xba   :  { %202 = dma.done.wait [#allocation4], 1024  }
  0xbb   :  { %203 = vsyncadd [#allocation4], 4294966272 }
  0xbc   :  { %118 = vsyncpa [#allocation3], 1 }
  0xbd   :  { %119 = vsyncpa [#allocation6], 1 }
  0xbe   :  { %120 = vsyncpa [#allocation4], 1 }

</bundles_post_ra>
